<compile_context>
chip_gen: v6e
topology: v6e:2x2x1
jax: 0.10.0
libtpu: 0.0.40
codegen_flags: <defaults>
</compile_context>

<pallas_src>
import math

import jax
import jax.numpy as jnp
from jax.experimental import pallas as pl
from jax.experimental.pallas import tpu as pltpu

LANE = 128      # hidden feature lanes (h_dim and 2*h_dim both fit in 128)
OUT_PAD = 8     # output lanes stored to HBM (lanes 0,1 real, 2..7 zero-logit)


def _round_up(n, m):
    return (n + m - 1) // m * m


def _cdiv(a, b):
    return (a + b - 1) // b


def _generator_kernel(
    x_ref,                       # (tm, in_pad)  f32
    w1_ref, b1_ref,              # (in_pad, 128), (1, 128)
    w21_ref, b21_ref,            # (128, 128),    (1, 128)
    w22_ref, b22_ref,
    w2_ref, b2_ref,
    wh_ref, bh_ref,              # fused heads' hidden layer: fc31 || fc41
    wo_ref, bo_ref,              # fused block-diagonal output: (128, OUT_PAD)
    out_ref,                     # (tm, OUT_PAD)
):
    def linear(h, w_ref, b_ref):
        return jnp.dot(h, w_ref[...], preferred_element_type=jnp.float32) + b_ref[...]

    # trunk: fc1 -> fc2_1 -> fc2_2 -> fc2 (all ReLU)
    h = jnp.maximum(linear(x_ref[...], w1_ref, b1_ref), 0.0)
    h = jnp.maximum(linear(h, w21_ref, b21_ref), 0.0)
    h = jnp.maximum(linear(h, w22_ref, b22_ref), 0.0)
    h = jnp.maximum(linear(h, w2_ref, b2_ref), 0.0)

    # both heads fused: one ReLU matmul + one narrow block-diagonal logit matmul
    hh = jnp.maximum(linear(h, wh_ref, bh_ref), 0.0)
    logits = linear(hh, wo_ref, bo_ref)      # (tm, OUT_PAD): lanes 0,1 real, rest 0
    out_ref[...] = jax.nn.sigmoid(logits)    # narrow store; wrapper slices [:, :2]


def init_raw_params(key, input_dim, h_dim):
    """Raw params in the PyTorch layout: w (out, in), b (out,)."""
    in1 = input_dim + 2
    names_dims = [
        ("fc1", h_dim, in1),
        ("fc2_1", h_dim, h_dim),
        ("fc2_2", h_dim, h_dim),
        ("fc2", h_dim, h_dim),
        ("fc31", h_dim, h_dim),
        ("fc32", 1, h_dim),
        ("fc41", h_dim, h_dim),
        ("fc42", 1, h_dim),
    ]
    keys = jax.random.split(key, len(names_dims))
    params = {}
    for k, (name, od, idim) in zip(keys, names_dims):
        bound = math.sqrt(6.0 / (idim + od))  # torch xavier_uniform_ on (out, in)
        params[name] = {
            "w": jax.random.uniform(k, (od, idim), jnp.float32, -bound, bound),
            "b": jnp.zeros((od,), jnp.float32),  # nn.init.constant_(bias, 0)
        }
    return params


def pack_params(raw, input_dim, h_dim):
    """One-time packing: transpose to (in,out), pad minimally, fuse the heads."""
    in1 = input_dim + 2
    in_pad = _round_up(in1, 8)
    assert in_pad <= LANE and 2 * h_dim <= LANE and OUT_PAD >= 2

    def pad_wt(w, in_dim, in_rows, out_dim):
        p = jnp.zeros((in_rows, LANE), jnp.float32)
        return p.at[:in_dim, :out_dim].set(w.T)

    def pad_b(b, out_dim):
        p = jnp.zeros((1, LANE), jnp.float32)
        return p.at[0, :out_dim].set(b)

    packed = {
        "w1": pad_wt(raw["fc1"]["w"], in1, in_pad, h_dim),      # (in_pad, 128)
        "b1": pad_b(raw["fc1"]["b"], h_dim),
        "w21": pad_wt(raw["fc2_1"]["w"], h_dim, LANE, h_dim),
        "b21": pad_b(raw["fc2_1"]["b"], h_dim),
        "w22": pad_wt(raw["fc2_2"]["w"], h_dim, LANE, h_dim),
        "b22": pad_b(raw["fc2_2"]["b"], h_dim),
        "w2": pad_wt(raw["fc2"]["w"], h_dim, LANE, h_dim),
        "b2": pad_b(raw["fc2"]["b"], h_dim),
    }

    # Fused head hidden layer: fc31 in cols [0,h), fc41 in cols [h,2h).
    wh = jnp.zeros((LANE, LANE), jnp.float32)
    wh = wh.at[:h_dim, :h_dim].set(raw["fc31"]["w"].T)
    wh = wh.at[:h_dim, h_dim:2 * h_dim].set(raw["fc41"]["w"].T)
    bh = jnp.zeros((1, LANE), jnp.float32)
    bh = bh.at[0, :h_dim].set(raw["fc31"]["b"])
    bh = bh.at[0, h_dim:2 * h_dim].set(raw["fc41"]["b"])

    # Fused narrow block-diagonal output: fc32 -> col 0 (rows [0,h)),
    # fc42 -> col 1 (rows [h,2h)); remaining OUT_PAD-2 columns stay zero.
    wo = jnp.zeros((LANE, OUT_PAD), jnp.float32)
    wo = wo.at[:h_dim, 0].set(raw["fc32"]["w"][0, :])
    wo = wo.at[h_dim:2 * h_dim, 1].set(raw["fc42"]["w"][0, :])
    bo = jnp.zeros((1, OUT_PAD), jnp.float32)
    bo = bo.at[0, 0].set(raw["fc32"]["b"][0])
    bo = bo.at[0, 1].set(raw["fc42"]["b"][0])

    packed.update(dict(wh=wh, bh=bh, wo=wo, bo=bo))
    return packed


def generator_forward(x, t, y, packed, flag_dropout=False, tm_max=2048):
    """Pallas forward of Generator. x:(N,input_dim), t:(N,1), y:(N,1) -> (N,2)."""
    if flag_dropout:
        # TODO(synk): stochastic training-mode dropout (p=0.2) not implemented.
        raise NotImplementedError(
            "flag_dropout=True (training-mode dropout) is not supported by this kernel")

    N = x.shape[0]
    in1 = x.shape[1] + t.shape[1] + y.shape[1]
    in_pad = _round_up(in1, 8)
    assert in_pad <= LANE
    assert packed["w1"].shape[0] == in_pad, "packed params built for a different input_dim"

    # Batch tiling: big tiles (per-grid-step overhead dominates this tiny MLP),
    # padding waste capped to < 8 rows per tile, and >= 2 tiles for mid/large
    # batches so the "parallel" axis shards across both TensorCores on v7x.
    n8 = _round_up(max(N, 1), 8)
    n_tiles = _cdiv(n8, tm_max)
    if n_tiles == 1 and n8 >= 1024:
        n_tiles = 2
    tm = _round_up(_cdiv(n8, n_tiles), 8)
    n_pad = tm * n_tiles

    # Narrow input slab: only in_pad (= round_up(input_dim+2, 8)) lanes, not 128.
    inputs = jnp.concatenate([x, t, y], axis=1).astype(jnp.float32)
    x_pad = jnp.zeros((n_pad, in_pad), jnp.float32).at[:N, :in1].set(inputs)

    args = (
        x_pad,
        packed["w1"], packed["b1"],
        packed["w21"], packed["b21"],
        packed["w22"], packed["b22"],
        packed["w2"], packed["b2"],
        packed["wh"], packed["bh"],
        packed["wo"], packed["bo"],
    )

    x_spec = pl.BlockSpec((tm, in_pad), lambda i: (i, 0))
    out_spec = pl.BlockSpec((tm, OUT_PAD), lambda i: (i, 0))

    def resident_spec(a):
        # Full array, constant block index -> stays resident in VMEM across grid steps.
        return pl.BlockSpec(a.shape, lambda i: (0,) * a.ndim)

    in_specs = [x_spec] + [resident_spec(a) for a in args[1:]]

    # Advisory cost estimate (real traffic, not padded-to-128 traffic).
    weight_bytes = sum(int(a.size) * 4 for a in args[1:])
    flops = 2 * n_pad * (in_pad * LANE + 4 * LANE * LANE + LANE * OUT_PAD)
    cost = pl.CostEstimate(
        flops=flops,
        transcendentals=n_pad * OUT_PAD,
        bytes_accessed=n_pad * (in_pad + OUT_PAD) * 4 + weight_bytes,
    )

    out_pad = pl.pallas_call(
        _generator_kernel,
        out_shape=jax.ShapeDtypeStruct((n_pad, OUT_PAD), jnp.float32),
        grid_spec=pltpu.PrefetchScalarGridSpec(
            num_scalar_prefetch=0,
            grid=(n_tiles,),
            in_specs=in_specs,
            out_specs=out_spec,
        ),
        compiler_params=pltpu.CompilerParams(
            dimension_semantics=("parallel",),
        ),
        cost_estimate=cost,
    )(*args)

    return out_pad[:N, :2]


def reference_forward(x, t, y, raw):
    inputs = jnp.concatenate([x, t, y], axis=1)

    def lin(h, name):
        return h @ raw[name]["w"].T + raw[name]["b"]

    h1 = jax.nn.relu(lin(inputs, "fc1"))
    h2_1 = jax.nn.relu(lin(h1, "fc2_1"))
    h2_2 = jax.nn.relu(lin(h2_1, "fc2_2"))
    h2 = jax.nn.relu(lin(h2_2, "fc2"))
    y1 = jax.nn.sigmoid(lin(jax.nn.relu(lin(h2, "fc31")), "fc32"))
    y2 = jax.nn.sigmoid(lin(jax.nn.relu(lin(h2, "fc41")), "fc42"))
    return jnp.concatenate([y1, y2], axis=1)


if __name__ == "__main__":
    input_dim = 16
    h_dim = 32
    batch = 8

    key = jax.random.PRNGKey(0)
    kx, kt, ky, kp = jax.random.split(key, 4)
    x = jax.random.normal(kx, (batch, input_dim), jnp.float32)
    t = jax.random.bernoulli(kt, 0.5, (batch, 1)).astype(jnp.float32)
    y = jax.random.bernoulli(ky, 0.5, (batch, 1)).astype(jnp.float32)

    raw = init_raw_params(kp, input_dim, h_dim)
    packed = pack_params(raw, input_dim, h_dim)

    out = generator_forward(x, t, y, packed, flag_dropout=False)
    out = jax.block_until_ready(out)

    ref = reference_forward(x, t, y, raw)
    assert out.shape == (batch, 2), out.shape
    assert jnp.allclose(out, ref, atol=1e-5, rtol=1e-5), (out, ref)
    print("KERNEL_OK")
</pallas_src>

<mosaic_0001>
module attributes {stable_mosaic.version = 11 : i64} {
  func.func @_generator_kernel(%arg0: i32, %arg1: memref<8x24xf32, #tpu.memory_space<vmem>>, %arg2: memref<24x128xf32, #tpu.memory_space<vmem>>, %arg3: memref<1x128xf32, #tpu.memory_space<vmem>>, %arg4: memref<128x128xf32, #tpu.memory_space<vmem>>, %arg5: memref<1x128xf32, #tpu.memory_space<vmem>>, %arg6: memref<128x128xf32, #tpu.memory_space<vmem>>, %arg7: memref<1x128xf32, #tpu.memory_space<vmem>>, %arg8: memref<128x128xf32, #tpu.memory_space<vmem>>, %arg9: memref<1x128xf32, #tpu.memory_space<vmem>>, %arg10: memref<128x128xf32, #tpu.memory_space<vmem>>, %arg11: memref<1x128xf32, #tpu.memory_space<vmem>>, %arg12: memref<128x8xf32, #tpu.memory_space<vmem>>, %arg13: memref<1x8xf32, #tpu.memory_space<vmem>>, %arg14: memref<8x8xf32, #tpu.memory_space<vmem>>) attributes {dimension_semantics = [#tpu.dimension_semantics<parallel>], iteration_bounds = array<i64: 1>, scalar_prefetch = 0 : i64, scratch_operands = 0 : i64, tpu.core_type = #tpu.core_type<tc>, window_params = [{transform_indices = @transform_0, window_bounds = array<i64: 8, 24>}, {pipeline_mode = #tpu.pipeline_mode<synchronous>, transform_indices = @transform_1, window_bounds = array<i64: 24, 128>}, {pipeline_mode = #tpu.pipeline_mode<synchronous>, transform_indices = @transform_2, window_bounds = array<i64: 1, 128>}, {pipeline_mode = #tpu.pipeline_mode<synchronous>, transform_indices = @transform_3, window_bounds = array<i64: 128, 128>}, {pipeline_mode = #tpu.pipeline_mode<synchronous>, transform_indices = @transform_4, window_bounds = array<i64: 1, 128>}, {pipeline_mode = #tpu.pipeline_mode<synchronous>, transform_indices = @transform_5, window_bounds = array<i64: 128, 128>}, {pipeline_mode = #tpu.pipeline_mode<synchronous>, transform_indices = @transform_6, window_bounds = array<i64: 1, 128>}, {pipeline_mode = #tpu.pipeline_mode<synchronous>, transform_indices = @transform_7, window_bounds = array<i64: 128, 128>}, {pipeline_mode = #tpu.pipeline_mode<synchronous>, transform_indices = @transform_8, window_bounds = array<i64: 1, 128>}, {pipeline_mode = #tpu.pipeline_mode<synchronous>, transform_indices = @transform_9, window_bounds = array<i64: 128, 128>}, {pipeline_mode = #tpu.pipeline_mode<synchronous>, transform_indices = @transform_10, window_bounds = array<i64: 1, 128>}, {pipeline_mode = #tpu.pipeline_mode<synchronous>, transform_indices = @transform_11, window_bounds = array<i64: 128, 8>}, {pipeline_mode = #tpu.pipeline_mode<synchronous>, transform_indices = @transform_12, window_bounds = array<i64: 1, 8>}, {transform_indices = @transform_13, window_bounds = array<i64: 8, 8>}]} {
    %c0 = arith.constant 0 : index
    %c0_0 = arith.constant 0 : index
    %0 = vector.load %arg1[%c0, %c0_0] : memref<8x24xf32, #tpu.memory_space<vmem>>, vector<8x24xf32>
    %c0_1 = arith.constant 0 : index
    %c0_2 = arith.constant 0 : index
    %1 = vector.load %arg2[%c0_1, %c0_2] : memref<24x128xf32, #tpu.memory_space<vmem>>, vector<24x128xf32>
    %cst = arith.constant dense<0.000000e+00> : vector<8x128xf32>
    %2 = tpu.matmul %0, %1, %cst {dimension_numbers = #tpu.dot_dimension_numbers<[1], [0], [0], [1], [0, 0, 1, 1], [], []>} : vector<8x24xf32>, vector<24x128xf32>, vector<8x128xf32> -> vector<8x128xf32>
    %c0_3 = arith.constant 0 : index
    %c0_4 = arith.constant 0 : index
    %3 = vector.load %arg3[%c0_3, %c0_4] : memref<1x128xf32, #tpu.memory_space<vmem>>, vector<1x128xf32>
    %4 = vector.broadcast %3 : vector<1x128xf32> to vector<8x128xf32>
    %5 = arith.addf %2, %4 : vector<8x128xf32>
    %cst_5 = arith.constant 0.000000e+00 : f32
    %6 = vector.broadcast %cst_5 : f32 to vector<8x128xf32>
    %7 = arith.maximumf %5, %6 : vector<8x128xf32>
    %c0_6 = arith.constant 0 : index
    %c0_7 = arith.constant 0 : index
    %8 = vector.load %arg4[%c0_6, %c0_7] : memref<128x128xf32, #tpu.memory_space<vmem>>, vector<128x128xf32>
    %cst_8 = arith.constant dense<0.000000e+00> : vector<8x128xf32>
    %9 = tpu.matmul %7, %8, %cst_8 {dimension_numbers = #tpu.dot_dimension_numbers<[1], [0], [0], [1], [0, 0, 1, 1], [], []>} : vector<8x128xf32>, vector<128x128xf32>, vector<8x128xf32> -> vector<8x128xf32>
    %c0_9 = arith.constant 0 : index
    %c0_10 = arith.constant 0 : index
    %10 = vector.load %arg5[%c0_9, %c0_10] : memref<1x128xf32, #tpu.memory_space<vmem>>, vector<1x128xf32>
    %11 = vector.broadcast %10 : vector<1x128xf32> to vector<8x128xf32>
    %12 = arith.addf %9, %11 : vector<8x128xf32>
    %cst_11 = arith.constant 0.000000e+00 : f32
    %13 = vector.broadcast %cst_11 : f32 to vector<8x128xf32>
    %14 = arith.maximumf %12, %13 : vector<8x128xf32>
    %c0_12 = arith.constant 0 : index
    %c0_13 = arith.constant 0 : index
    %15 = vector.load %arg6[%c0_12, %c0_13] : memref<128x128xf32, #tpu.memory_space<vmem>>, vector<128x128xf32>
    %cst_14 = arith.constant dense<0.000000e+00> : vector<8x128xf32>
    %16 = tpu.matmul %14, %15, %cst_14 {dimension_numbers = #tpu.dot_dimension_numbers<[1], [0], [0], [1], [0, 0, 1, 1], [], []>} : vector<8x128xf32>, vector<128x128xf32>, vector<8x128xf32> -> vector<8x128xf32>
    %c0_15 = arith.constant 0 : index
    %c0_16 = arith.constant 0 : index
    %17 = vector.load %arg7[%c0_15, %c0_16] : memref<1x128xf32, #tpu.memory_space<vmem>>, vector<1x128xf32>
    %18 = vector.broadcast %17 : vector<1x128xf32> to vector<8x128xf32>
    %19 = arith.addf %16, %18 : vector<8x128xf32>
    %cst_17 = arith.constant 0.000000e+00 : f32
    %20 = vector.broadcast %cst_17 : f32 to vector<8x128xf32>
    %21 = arith.maximumf %19, %20 : vector<8x128xf32>
    %c0_18 = arith.constant 0 : index
    %c0_19 = arith.constant 0 : index
    %22 = vector.load %arg8[%c0_18, %c0_19] : memref<128x128xf32, #tpu.memory_space<vmem>>, vector<128x128xf32>
    %cst_20 = arith.constant dense<0.000000e+00> : vector<8x128xf32>
    %23 = tpu.matmul %21, %22, %cst_20 {dimension_numbers = #tpu.dot_dimension_numbers<[1], [0], [0], [1], [0, 0, 1, 1], [], []>} : vector<8x128xf32>, vector<128x128xf32>, vector<8x128xf32> -> vector<8x128xf32>
    %c0_21 = arith.constant 0 : index
    %c0_22 = arith.constant 0 : index
    %24 = vector.load %arg9[%c0_21, %c0_22] : memref<1x128xf32, #tpu.memory_space<vmem>>, vector<1x128xf32>
    %25 = vector.broadcast %24 : vector<1x128xf32> to vector<8x128xf32>
    %26 = arith.addf %23, %25 : vector<8x128xf32>
    %cst_23 = arith.constant 0.000000e+00 : f32
    %27 = vector.broadcast %cst_23 : f32 to vector<8x128xf32>
    %28 = arith.maximumf %26, %27 : vector<8x128xf32>
    %c0_24 = arith.constant 0 : index
    %c0_25 = arith.constant 0 : index
    %29 = vector.load %arg10[%c0_24, %c0_25] : memref<128x128xf32, #tpu.memory_space<vmem>>, vector<128x128xf32>
    %cst_26 = arith.constant dense<0.000000e+00> : vector<8x128xf32>
    %30 = tpu.matmul %28, %29, %cst_26 {dimension_numbers = #tpu.dot_dimension_numbers<[1], [0], [0], [1], [0, 0, 1, 1], [], []>} : vector<8x128xf32>, vector<128x128xf32>, vector<8x128xf32> -> vector<8x128xf32>
    %c0_27 = arith.constant 0 : index
    %c0_28 = arith.constant 0 : index
    %31 = vector.load %arg11[%c0_27, %c0_28] : memref<1x128xf32, #tpu.memory_space<vmem>>, vector<1x128xf32>
    %32 = vector.broadcast %31 : vector<1x128xf32> to vector<8x128xf32>
    %33 = arith.addf %30, %32 : vector<8x128xf32>
    %cst_29 = arith.constant 0.000000e+00 : f32
    %34 = vector.broadcast %cst_29 : f32 to vector<8x128xf32>
    %35 = arith.maximumf %33, %34 : vector<8x128xf32>
    %c0_30 = arith.constant 0 : index
    %c0_31 = arith.constant 0 : index
    %36 = vector.load %arg12[%c0_30, %c0_31] : memref<128x8xf32, #tpu.memory_space<vmem>>, vector<128x8xf32>
    %cst_32 = arith.constant dense<0.000000e+00> : vector<8x8xf32>
    %37 = tpu.matmul %35, %36, %cst_32 {dimension_numbers = #tpu.dot_dimension_numbers<[1], [0], [0], [1], [0, 0, 1, 1], [], []>} : vector<8x128xf32>, vector<128x8xf32>, vector<8x8xf32> -> vector<8x8xf32>
    %c0_33 = arith.constant 0 : index
    %c0_34 = arith.constant 0 : index
    %38 = vector.load %arg13[%c0_33, %c0_34] : memref<1x8xf32, #tpu.memory_space<vmem>>, vector<1x8xf32>
    %39 = vector.broadcast %38 : vector<1x8xf32> to vector<8x8xf32>
    %40 = arith.addf %37, %39 : vector<8x8xf32>
    %41 = arith.negf %40 : vector<8x8xf32>
    %42 = math.exp %41 : vector<8x8xf32>
    %cst_35 = arith.constant 1.000000e+00 : f32
    %43 = vector.broadcast %cst_35 : f32 to vector<8x8xf32>
    %44 = arith.addf %43, %42 : vector<8x8xf32>
    %45 = arith.divf %43, %44 : vector<8x8xf32>
    %c0_36 = arith.constant 0 : index
    %c0_37 = arith.constant 0 : index
    %46 = vector.load %arg14[%c0_36, %c0_37] : memref<8x8xf32, #tpu.memory_space<vmem>>, vector<8x8xf32>
    tpu.vector_store %arg14[%c0_36, %c0_37], %45 {strides = array<i32>} : memref<8x8xf32, #tpu.memory_space<vmem>>, vector<8x8xf32>,
    return
  }
  func.func @transform_0(%arg0: i32) -> (i32, i32) {
    %c0_i32 = arith.constant 0 : i32
    %c0_i32_0 = arith.constant 0 : i32
    return %arg0, %c0_i32 : i32, i32
  }
  func.func @transform_1(%arg0: i32) -> (i32, i32) {
    %c0_i32 = arith.constant 0 : i32
    %c0_i32_0 = arith.constant 0 : i32
    %c0_i32_1 = arith.constant 0 : i32
    return %c0_i32, %c0_i32_0 : i32, i32
  }
  func.func @transform_2(%arg0: i32) -> (i32, i32) {
    %c0_i32 = arith.constant 0 : i32
    %c0_i32_0 = arith.constant 0 : i32
    %c0_i32_1 = arith.constant 0 : i32
    return %c0_i32, %c0_i32_0 : i32, i32
  }
  func.func @transform_3(%arg0: i32) -> (i32, i32) {
    %c0_i32 = arith.constant 0 : i32
    %c0_i32_0 = arith.constant 0 : i32
    %c0_i32_1 = arith.constant 0 : i32
    return %c0_i32, %c0_i32_0 : i32, i32
  }
  func.func @transform_4(%arg0: i32) -> (i32, i32) {
    %c0_i32 = arith.constant 0 : i32
    %c0_i32_0 = arith.constant 0 : i32
    %c0_i32_1 = arith.constant 0 : i32
    return %c0_i32, %c0_i32_0 : i32, i32
  }
  func.func @transform_5(%arg0: i32) -> (i32, i32) {
    %c0_i32 = arith.constant 0 : i32
    %c0_i32_0 = arith.constant 0 : i32
    %c0_i32_1 = arith.constant 0 : i32
    return %c0_i32, %c0_i32_0 : i32, i32
  }
  func.func @transform_6(%arg0: i32) -> (i32, i32) {
    %c0_i32 = arith.constant 0 : i32
    %c0_i32_0 = arith.constant 0 : i32
    %c0_i32_1 = arith.constant 0 : i32
    return %c0_i32, %c0_i32_0 : i32, i32
  }
  func.func @transform_7(%arg0: i32) -> (i32, i32) {
    %c0_i32 = arith.constant 0 : i32
    %c0_i32_0 = arith.constant 0 : i32
    %c0_i32_1 = arith.constant 0 : i32
    return %c0_i32, %c0_i32_0 : i32, i32
  }
  func.func @transform_8(%arg0: i32) -> (i32, i32) {
    %c0_i32 = arith.constant 0 : i32
    %c0_i32_0 = arith.constant 0 : i32
    %c0_i32_1 = arith.constant 0 : i32
    return %c0_i32, %c0_i32_0 : i32, i32
  }
  func.func @transform_9(%arg0: i32) -> (i32, i32) {
    %c0_i32 = arith.constant 0 : i32
    %c0_i32_0 = arith.constant 0 : i32
    %c0_i32_1 = arith.constant 0 : i32
    return %c0_i32, %c0_i32_0 : i32, i32
  }
  func.func @transform_10(%arg0: i32) -> (i32, i32) {
    %c0_i32 = arith.constant 0 : i32
    %c0_i32_0 = arith.constant 0 : i32
    %c0_i32_1 = arith.constant 0 : i32
    return %c0_i32, %c0_i32_0 : i32, i32
  }
  func.func @transform_11(%arg0: i32) -> (i32, i32) {
    %c0_i32 = arith.constant 0 : i32
    %c0_i32_0 = arith.constant 0 : i32
    %c0_i32_1 = arith.constant 0 : i32
    return %c0_i32, %c0_i32_0 : i32, i32
  }
  func.func @transform_12(%arg0: i32) -> (i32, i32) {
    %c0_i32 = arith.constant 0 : i32
    %c0_i32_0 = arith.constant 0 : i32
    %c0_i32_1 = arith.constant 0 : i32
    return %c0_i32, %c0_i32_0 : i32, i32
  }
  func.func @transform_13(%arg0: i32) -> (i32, i32) {
    %c0_i32 = arith.constant 0 : i32
    %c0_i32_0 = arith.constant 0 : i32
    return %arg0, %c0_i32 : i32, i32
  }
}

</mosaic_0001>

<bundles_post_ra>
// kernel: tpu_custom_call.1
= control target key start
LH: loop header
LB: loop body
LE: loop exit
PB: predicated region body
PF: predicated region fallthrough
CT: control target
= control target key end

     0   :  { %18 = vsyncpa [#allocation3], 0  ;;  %s1400_s0 = inlined_call_operand.vmem [shape: f32[8,24], index: 0, kind: input, shape index: {}]   ;;  %s1401_s1 = inlined_call_operand.hbm [shape: f32[24,128], index: 1, kind: input, shape index: {}]   ;;  %s1402_s2 = inlined_call_operand.vmem [shape: f32[1,128], index: 2, kind: input, shape index: {}]   ;;  %s1403_s3 = inlined_call_operand.vmem [shape: f32[128,128], index: 3, kind: input, shape index: {}]   ;;  %s1404_s4 = inlined_call_operand.vmem [shape: f32[1,128], index: 4, kind: input, shape index: {}]   ;;  %s1405_s5 = inlined_call_operand.hbm [shape: f32[128,128], index: 5, kind: input, shape index: {}]   ;;  %s1406_s6 = inlined_call_operand.vmem [shape: f32[1,128], index: 6, kind: input, shape index: {}]   ;;  %s1407_s7 = inlined_call_operand.hbm [shape: f32[128,128], index: 7, kind: input, shape index: {}]   ;;  %s1408_s8 = inlined_call_operand.vmem [shape: f32[1,128], index: 8, kind: input, shape index: {}]   ;;  %s1409_s9 = inlined_call_operand.hbm [shape: f32[128,128], index: 9, kind: input, shape index: {}]   ;;  %s1410_s10 = inlined_call_operand.vmem [shape: f32[1,128], index: 10, kind: input, shape index: {}]   ;;  %s1411_s11 = inlined_call_operand.vmem [shape: f32[128,8], index: 11, kind: input, shape index: {}]   ;;  %s1412_s12 = inlined_call_operand.vmem [shape: f32[1,8], index: 12, kind: input, shape index: {}]   ;;  %s1413_s13 = inlined_call_operand.hbm [shape: f32[8,8], index: 13, kind: output, shape index: {}]  }
   0x1   :  { %19 = vsyncpa [#allocation6], 0 }
   0x2   :  { %20 = vsyncpa [#allocation9], 0 }
   0x3   :  { %21 = vsyncpa [#allocation4], 0  ;;  %s1082_s25 = smov [#allocation5]   ;;  %s1083_s27 = smov [#allocation2]  }
   0x4   :  { %s47_s26 = sshll.u32 %s1082_s25, 4  ;;  %s29_s28 = sshll.u32 %s1083_s27, 4  ;;  %s48_s26 = int_to_ptr.vmem [resolvable:$true] %s47_s26  ;;  %s30_s28 = int_to_ptr.vmem [resolvable:$true] %s29_s28 }
   0x5   :  { %s982_s29 = scalar_lea.vmem %s48_s26, 2048  ;;  %p987_p1 = scmp.lt.s32.totalorder %s48_s26, %s48_s26 }
   0x6   :  { %p983_p0 = scmp.ne.s32.totalorder %s48_s26, %s982_s29  ;;  %p988_p2 = scmp.lt.s32.totalorder %s982_s29, %s982_s29 }
   0x8   :  { %p989_p3 = por %p988_p2, %p987_p1 }
   0xa   :  { %p990_p4 = pnand %p989_p3, %p983_p0 }
   0xc   :  { %993 = shalt.err (!%p990_p4)
}
   0xd   :  { %s1084_s30 = smov 128   ;;  %s1085_s14 = smov 8  }
   0xe   :  { %53 = dma.hbm_to_vmem [thread:$0]  %s1405_s5, 2048, %s48_s26, [#allocation6], %s1084_s30, %s1084_s30, %s1085_s14  }
   0xf   :  { %s1002_s17 = scalar_lea.vmem %s30_s28, 384  ;;  %p1007_p6 = scmp.lt.s32.totalorder %s30_s28, %s30_s28 }
  0x10   :  { %p1003_p5 = scmp.ne.s32.totalorder %s30_s28, %s1002_s17  ;;  %p1008_p7 = scmp.lt.s32.totalorder %s1002_s17, %s1002_s17 }
  0x12   :  { %p1009_p8 = por %p1008_p7, %p1007_p6 }
  0x14   :  { %p1010_p9 = pnand %p1009_p8, %p1003_p5 }
  0x16   :  { %1013 = shalt.err (!%p1010_p9)
}
  0x17   :  { %35 = dma.hbm_to_vmem [thread:$0]  %s1401_s1, 384, %s30_s28, [#allocation3], %s1084_s30, %s1084_s30, %s1085_s14  }
  0x18   :  { %s1086_s20 = smov [#allocation7]   ;;  %s1087_s22 = smov [#allocation8]  }
  0x19   :  { %s61_s21 = sshll.u32 %s1086_s20, 4  ;;  %s75_s23 = sshll.u32 %s1087_s22, 4  ;;  %s62_s21 = int_to_ptr.vmem [resolvable:$true] %s61_s21  ;;  %s76_s23 = int_to_ptr.vmem [resolvable:$true] %s75_s23 }
  0x1a   :  { %s1022_s5 = scalar_lea.vmem %s62_s21, 2048  ;;  %p1027_p11 = scmp.lt.s32.totalorder %s62_s21, %s62_s21 }
  0x1b   :  { %p1023_p10 = scmp.ne.s32.totalorder %s62_s21, %s1022_s5  ;;  %p1028_p12 = scmp.lt.s32.totalorder %s1022_s5, %s1022_s5 }
  0x1d   :  { %p1029_p13 = por %p1028_p12, %p1027_p11 }
  0x1f   :  { %p1030_p0 = pnand %p1029_p13, %p1023_p10 }
  0x21   :  { %1033 = shalt.err (!%p1030_p0)
}
  0x22   :  { %67 = dma.hbm_to_vmem [thread:$0]  %s1407_s7, 2048, %s62_s21, [#allocation6], %s1084_s30, %s1084_s30, %s1085_s14  }
  0x23   :  { %s1042_s1 = scalar_lea.vmem %s76_s23, 2048  ;;  %p1047_p2 = scmp.lt.s32.totalorder %s76_s23, %s76_s23 }
  0x24   :  { %p1043_p1 = scmp.ne.s32.totalorder %s76_s23, %s1042_s1  ;;  %p1048_p3 = scmp.lt.s32.totalorder %s1042_s1, %s1042_s1 }
  0x26   :  { %p1049_p4 = por %p1048_p3, %p1047_p2 }
  0x28   :  { %p1050_p5 = pnand %p1049_p4, %p1043_p1 }
  0x2a   :  { %1053 = shalt.err (!%p1050_p5)
}
  0x2b   :  { %81 = dma.hbm_to_vmem [thread:$0]  %s1409_s9, 2048, %s76_s23, [#allocation9], %s1084_s30, %s1084_s30, %s1085_s14  }
  0x2c   :  { %1074 = dma.done.wait [#allocation3], 384  }
  0x2d   :  { %1075 = vsyncadd [#allocation3], 4294966912 }
  0x2e   :  { %1076 = dma.done.wait [#allocation6], 4096  }
  0x2f   :  { %1077 = vsyncadd [#allocation6], 4294963200 }
  0x30   :  { %1078 = dma.done.wait [#allocation9], 2048  }
  0x31   :  { %1079 = vsyncadd [#allocation9], 4294965248  ;;  %v1088_v0 = vmov 0.0   ;;  %vm1089_vm0 = vmmov 0   ;;  %v103_v1 = vld [vmem:[#allocation2 + $0x10] sm:$0xff]  ;;  %v102_v2 = vld [vmem:[#allocation2 + $0x8] sm:$0xff] }
  0x32   :  { %777 = vmatprep.subr.mxu0 %v1088_v0  ;;  %783 = vmatprep.mubr.msk.f32.mxu0 %vm1089_vm0, %v1088_v0  ;;  %v201_v3 = vld [vmem:[%s1403_s3 + $0x78] sm:$0xff]  ;;  %v200_v4 = vld [vmem:[%s1403_s3 + $0x70] sm:$0xff]  ;;  %v101_v5 = vld [vmem:[#allocation2] sm:$0xff]  ;;  %vm111_vm1 = vcmask 195584   ;;  %vm661_vm2 = vcmask 64512  }
  0x33   :  { %786 = vmatprep.subr.mxu1 %v1088_v0  ;;  %818 = vmatprep.mubr.msk.f32.mxu1 %vm1089_vm0, %v1088_v0  ;;  %v100_v6 = vld [vmem:[%s1400_s0] sm:$0xff]  ;;  %v199_v7 = vld [vmem:[%s1403_s3 + $0x68] sm:$0xff]  ;;  %v197_v9 = vld [vmem:[%s1403_s3 + $0x58] sm:$0xff] }
  0x34   :  { %778 = vmatpush3.msra.mxu0 %v103_v1  ;;  %787 = vmatpush3.msra.mxu1 %v201_v3  ;;  %v198_v8 = vld [vmem:[%s1403_s3 + $0x60] sm:$0xff]  ;;  %v196_v10 = vld [vmem:[%s1403_s3 + $0x50] sm:$0xff]  ;;  %v195_v11 = vld [vmem:[%s1403_s3 + $0x48] sm:$0xff] }
  0x35   :  { %779 = vmatprep.subr.mxu0 %v1088_v0  ;;  %788 = vmatprep.subr.mxu1 %v1088_v0  ;;  %v194_v12 = vld [vmem:[%s1403_s3 + $0x40] sm:$0xff]  ;;  %v193_v13 = vld [vmem:[%s1403_s3 + $0x38] sm:$0xff]  ;;  %v192_v14 = vld [vmem:[%s1403_s3 + $0x30] sm:$0xff] }
  0x36   :  { %780 = vmatpush3.msra.mxu0 %v102_v2  ;;  %789 = vmatpush3.msra.mxu1 %v200_v4  ;;  %v191_v15 = vld [vmem:[%s1403_s3 + $0x28] sm:$0xff]  ;;  %v190_v16 = vld [vmem:[%s1403_s3 + $0x20] sm:$0xff]  ;;  %v189_v17 = vld [vmem:[%s1403_s3 + $0x18] sm:$0xff] }
  0x37   :  { %781 = vmatprep.subr.mxu0 %v1088_v0  ;;  %790 = vmatprep.subr.mxu1 %v1088_v0  ;;  %v188_v18 = vld [vmem:[%s1403_s3 + $0x10] sm:$0xff]  ;;  %v187_v19 = vld [vmem:[%s1403_s3 + $0x8] sm:$0xff]  ;;  %v186_v20 = vld [vmem:[%s1403_s3] sm:$0xff] }
  0x38   :  { %782 = vmatpush3.msra.mxu0 %v101_v5  ;;  %791 = vmatpush3.msra.mxu1 %v199_v7  ;;  %v295_v21 = vld [vmem:[#allocation5 + $0x78] sm:$0xff]  ;;  %v294_v22 = vld [vmem:[#allocation5 + $0x70] sm:$0xff]  ;;  %v293_v23 = vld [vmem:[#allocation5 + $0x68] sm:$0xff] }
  0x39   :  { %784 = vmatmul.mubr.msk.f32.vlgmr.msra.gmra.mxu0 %vm111_vm1, %v100_v6  ;;  %792 = vmatprep.subr.mxu1 %v1088_v0  ;;  %v292_v24 = vld [vmem:[#allocation5 + $0x60] sm:$0xff]  ;;  %v291_v25 = vld [vmem:[#allocation5 + $0x58] sm:$0xff]  ;;  %v290_v26 = vld [vmem:[#allocation5 + $0x50] sm:$0xff] }
  0x3a   :  { %821 = vmatprep.subr.mxu0 %v1088_v0  ;;  %793 = vmatpush3.msra.mxu1 %v198_v8  ;;  %v289_v27 = vld [vmem:[#allocation5 + $0x48] sm:$0xff]  ;;  %v288_v28 = vld [vmem:[#allocation5 + $0x40] sm:$0xff]  ;;  %v287_v29 = vld [vmem:[#allocation5 + $0x38] sm:$0xff] }
  0x3b   :  { %853 = vmatprep.mubr.msk.f32.mxu0 %vm1089_vm0, %v1088_v0  ;;  %794 = vmatprep.subr.mxu1 %v1088_v0  ;;  %v286_v30 = vld [vmem:[#allocation5 + $0x30] sm:$0xff]  ;;  %v285_v31 = vld [vmem:[#allocation5 + $0x28] sm:$0xff]  ;;  %v284_v32 = vld [vmem:[#allocation5 + $0x20] sm:$0xff] }
  0x3c   :  { %795 = vmatpush3.msra.mxu1 %v197_v9  ;;  %822 = vmatpush3.msra.mxu0 %v295_v21  ;;  %v283_v33 = vld [vmem:[#allocation5 + $0x18] sm:$0xff]  ;;  %v680_v34 = vld [vmem:[%s1402_s2] ss:$0 sm:$0xff]  ;;  %v282_v39 = vld [vmem:[#allocation5 + $0x10] sm:$0xff] }
  0x3d   :  { %796 = vmatprep.subr.mxu1 %v1088_v0  ;;  %823 = vmatprep.subr.mxu0 %v1088_v0  ;;  %v281_v40 = vld [vmem:[#allocation5 + $0x8] sm:$0xff]  ;;  %v280_v41 = vld [vmem:[#allocation5] sm:$0xff]  ;;  %v389_v42 = vld [vmem:[#allocation7 + $0x78] sm:$0xff] }
  0x3e   :  { %797 = vmatpush3.msra.mxu1 %v196_v10  ;;  %824 = vmatpush3.msra.mxu0 %v294_v22  ;;  %v388_v43 = vld [vmem:[#allocation7 + $0x70] sm:$0xff]  ;;  %v387_v44 = vld [vmem:[#allocation7 + $0x68] sm:$0xff]  ;;  %v386_v45 = vld [vmem:[#allocation7 + $0x60] sm:$0xff] }
  0x3f   :  { %798 = vmatprep.subr.mxu1 %v1088_v0  ;;  %825 = vmatprep.subr.mxu0 %v1088_v0  ;;  %v385_v46 = vld [vmem:[#allocation7 + $0x58] sm:$0xff]  ;;  %v384_v47 = vld [vmem:[#allocation7 + $0x50] sm:$0xff]  ;;  %v383_v48 = vld [vmem:[#allocation7 + $0x48] sm:$0xff] }
  0x40   :  { %799 = vmatpush3.msra.mxu1 %v195_v11  ;;  %826 = vmatpush3.msra.mxu0 %v293_v23  ;;  %v382_v49 = vld [vmem:[#allocation7 + $0x40] sm:$0xff]  ;;  %v381_v50 = vld [vmem:[#allocation7 + $0x38] sm:$0xff]  ;;  %v380_v51 = vld [vmem:[#allocation7 + $0x30] sm:$0xff] }
  0x41   :  { %800 = vmatprep.subr.mxu1 %v1088_v0  ;;  %827 = vmatprep.subr.mxu0 %v1088_v0  ;;  %v379_v52 = vld [vmem:[#allocation7 + $0x28] sm:$0xff]  ;;  %v378_v53 = vld [vmem:[#allocation7 + $0x20] sm:$0xff]  ;;  %v377_v54 = vld [vmem:[#allocation7 + $0x18] sm:$0xff] }
  0x42   :  { %801 = vmatpush3.msra.mxu1 %v194_v12  ;;  %828 = vmatpush3.msra.mxu0 %v292_v24  ;;  %v682_v55 = vld [vmem:[%s1404_s4] ss:$0 sm:$0xff]  ;;  %v376_v60 = vld [vmem:[#allocation7 + $0x10] sm:$0xff]  ;;  %v374_v62 = vld [vmem:[#allocation7] sm:$0xff] }
  0x43   :  { %802 = vmatprep.subr.mxu1 %v1088_v0  ;;  %829 = vmatprep.subr.mxu0 %v1088_v0  ;;  %v375_v61 = vld [vmem:[#allocation7 + $0x8] sm:$0xff]  ;;  %v483_v63 = vld [vmem:[#allocation8 + $0x78] sm:$0xff]  ;;  %v482_v1 = vld [vmem:[#allocation8 + $0x70] sm:$0xff] }
  0x44   :  { %803 = vmatpush3.msra.mxu1 %v193_v13  ;;  %830 = vmatpush3.msra.mxu0 %v291_v25  ;;  %v481_v2 = vld [vmem:[#allocation8 + $0x68] sm:$0xff]  ;;  %v480_v3 = vld [vmem:[#allocation8 + $0x60] sm:$0xff]  ;;  %v479_v4 = vld [vmem:[#allocation8 + $0x58] sm:$0xff] }
  0x45   :  { %804 = vmatprep.subr.mxu1 %v1088_v0  ;;  %831 = vmatprep.subr.mxu0 %v1088_v0  ;;  %v478_v5 = vld [vmem:[#allocation8 + $0x50] sm:$0xff]  ;;  %v477_v6 = vld [vmem:[#allocation8 + $0x48] sm:$0xff]  ;;  %v476_v7 = vld [vmem:[#allocation8 + $0x40] sm:$0xff] }
  0x46   :  { %805 = vmatpush3.msra.mxu1 %v192_v14  ;;  %832 = vmatpush3.msra.mxu0 %v290_v26  ;;  %v475_v8 = vld [vmem:[#allocation8 + $0x38] sm:$0xff]  ;;  %v474_v9 = vld [vmem:[#allocation8 + $0x30] sm:$0xff]  ;;  %v473_v10 = vld [vmem:[#allocation8 + $0x28] sm:$0xff] }
  0x47   :  { %806 = vmatprep.subr.mxu1 %v1088_v0  ;;  %833 = vmatprep.subr.mxu0 %v1088_v0  ;;  %v472_v11 = vld [vmem:[#allocation8 + $0x20] sm:$0xff]  ;;  %v471_v12 = vld [vmem:[#allocation8 + $0x18] sm:$0xff]  ;;  %v683_v13 = vld [vmem:[%s1406_s6] ss:$0 sm:$0xff] }
  0x48   :  { %807 = vmatpush3.msra.mxu1 %v191_v15  ;;  %834 = vmatpush3.msra.mxu0 %v289_v27  ;;  %v577_v21 = vld [vmem:[%s1411_s11 + $0x78] sm:$0xff]  ;;  %v576_v22 = vld [vmem:[%s1411_s11 + $0x70] sm:$0xff]  ;;  %v575_v23 = vld [vmem:[%s1411_s11 + $0x68] sm:$0xff] }
  0x49   :  { %808 = vmatprep.subr.mxu1 %v1088_v0  ;;  %835 = vmatprep.subr.mxu0 %v1088_v0  ;;  %v574_v24 = vld [vmem:[%s1411_s11 + $0x60] sm:$0xff]  ;;  %v573_v25 = vld [vmem:[%s1411_s11 + $0x58] sm:$0xff]  ;;  %v572_v26 = vld [vmem:[%s1411_s11 + $0x50] sm:$0xff] }
  0x4a   :  { %809 = vmatpush3.msra.mxu1 %v190_v16  ;;  %836 = vmatpush3.msra.mxu0 %v288_v28  ;;  %v571_v27 = vld [vmem:[%s1411_s11 + $0x48] sm:$0xff]  ;;  %v570_v28 = vld [vmem:[%s1411_s11 + $0x40] sm:$0xff] }
  0x4b   :  { %810 = vmatprep.subr.mxu1 %v1088_v0  ;;  %837 = vmatprep.subr.mxu0 %v1088_v0 }
  0x4c   :  { %811 = vmatpush3.msra.mxu1 %v189_v17  ;;  %838 = vmatpush3.msra.mxu0 %v287_v29  ;;  %v569_v29 = vld [vmem:[%s1411_s11 + $0x38] sm:$0xff] }
  0x4d   :  { %812 = vmatprep.subr.mxu1 %v1088_v0  ;;  %839 = vmatprep.subr.mxu0 %v1088_v0 }
  0x4e   :  { %813 = vmatpush3.msra.mxu1 %v188_v18  ;;  %840 = vmatpush3.msra.mxu0 %v286_v30  ;;  %v470_v18 = vld [vmem:[#allocation8 + $0x10] sm:$0xff]  ;;  %v568_v30 = vld [vmem:[%s1411_s11 + $0x30] sm:$0xff] }
  0x4f   :  { %814 = vmatprep.subr.mxu1 %v1088_v0  ;;  %841 = vmatprep.subr.mxu0 %v1088_v0 }
  0x50   :  { %815 = vmatpush3.msra.mxu1 %v187_v19  ;;  %842 = vmatpush3.msra.mxu0 %v285_v31  ;;  %v469_v19 = vld [vmem:[#allocation8 + $0x8] sm:$0xff]  ;;  %v567_v31 = vld [vmem:[%s1411_s11 + $0x28] sm:$0xff] }
  0x51   :  { %816 = vmatprep.subr.mxu1 %v1088_v0  ;;  %843 = vmatprep.subr.mxu0 %v1088_v0 }
  0x52   :  { %817 = vmatpush3.msra.mxu1 %v186_v20  ;;  %844 = vmatpush3.msra.mxu0 %v284_v32  ;;  %v468_v20 = vld [vmem:[#allocation8] sm:$0xff]  ;;  %v566_v32 = vld [vmem:[%s1411_s11 + $0x20] sm:$0xff] }
  0x53   :  { %856 = vmatprep.subr.mxu1 %v1088_v0  ;;  %845 = vmatprep.subr.mxu0 %v1088_v0 }
  0x54   :  { %846 = vmatpush3.msra.mxu0 %v283_v33  ;;  %v565_v33 = vld [vmem:[%s1411_s11 + $0x18] sm:$0xff] }
  0x55   :  { %847 = vmatprep.subr.mxu0 %v1088_v0 }
  0x56   :  { %848 = vmatpush3.msra.mxu0 %v282_v39  ;;  %v564_v39 = vld [vmem:[%s1411_s11 + $0x10] sm:$0xff] }
  0x57   :  { %849 = vmatprep.subr.mxu0 %v1088_v0 }
  0x58   :  { %850 = vmatpush3.msra.mxu0 %v281_v40  ;;  %v563_v40 = vld [vmem:[%s1411_s11 + $0x8] sm:$0xff] }
  0x59   :  { %851 = vmatprep.subr.mxu0 %v1088_v0 }
  0x5a   :  { %852 = vmatpush3.msra.mxu0 %v280_v41  ;;  %v562_v41 = vld [vmem:[%s1411_s11] sm:$0xff]  ;;  %s1090_s11 = smov [#allocation10]  }
  0x5b   :  { %891 = vmatprep.subr.mxu0 %v1088_v0  ;;  %s669_s29 = sshll.u32 %s1090_s11, 4  ;;  %s670_s29 = int_to_ptr.vmem [resolvable:$true] %s669_s29 }
  0x5c   :  { %p1059_p7 = scmp.lt.s32.totalorder %s670_s29, %s670_s29 }
  0xf9   :  { %v181_v35 = vpop.f32.mrf.mxu0 }
  0xfa   :  { %v182_v36 = vadd.f32 %v680_v34, %v181_v35  ;;  %v684_v34 = vld [vmem:[%s1408_s8] ss:$0 sm:$0xff] }
  0xfb   :  { %v785_v37 = vpop.f32.mrf.mxu0 }
  0xfc   :  { %v185_v38 = vmax.f32 %v182_v36, 0.0 }
  0xfe   :  { %819 = vmatmul.mubr.f32.vlgmr.msra.gmra.mxu1 %v185_v38 }
  0xff   :  { %888 = vmatprep.mubr.msk.f32.mxu1 %vm1089_vm0, %v1088_v0  ;;  %857 = vmatpush3.msra.mxu1 %v389_v42  ;;  %v685_v42 = vld [vmem:[%s1410_s10] ss:$0 sm:$0xff]  ;;  %s1054_s10 = scalar_lea.vmem %s670_s29, 128 }
 0x100   :  { %858 = vmatprep.subr.mxu1 %v1088_v0  ;;  %p1055_p6 = scmp.ne.s32.totalorder %s670_s29, %s1054_s10  ;;  %p1060_p8 = scmp.lt.s32.totalorder %s1054_s10, %s1054_s10 }
 0x101   :  { %859 = vmatpush3.msra.mxu1 %v388_v43 }
 0x102   :  { %860 = vmatprep.subr.mxu1 %v1088_v0  ;;  %p1061_p9 = por %p1060_p8, %p1059_p7 }
 0x103   :  { %861 = vmatpush3.msra.mxu1 %v387_v44 }
 0x104   :  { %862 = vmatprep.subr.mxu1 %v1088_v0  ;;  %p1062_p10 = pnand %p1061_p9, %p1055_p6 }
 0x105   :  { %863 = vmatpush3.msra.mxu1 %v386_v45 }
 0x106   :  { %864 = vmatprep.subr.mxu1 %v1088_v0 }
 0x107   :  { %865 = vmatpush3.msra.mxu1 %v385_v46 }
 0x108   :  { %866 = vmatprep.subr.mxu1 %v1088_v0 }
 0x109   :  { %867 = vmatpush3.msra.mxu1 %v384_v47  ;;  %v686_v47 = vld [vmem:[%s1412_s12] ss:$0 sm:$0xff] }
 0x10a   :  { %868 = vmatprep.subr.mxu1 %v1088_v0 }
 0x10b   :  { %869 = vmatpush3.msra.mxu1 %v383_v48 }
 0x10c   :  { %870 = vmatprep.subr.mxu1 %v1088_v0 }
 0x10d   :  { %871 = vmatpush3.msra.mxu1 %v382_v49 }
 0x10e   :  { %872 = vmatprep.subr.mxu1 %v1088_v0 }
 0x10f   :  { %873 = vmatpush3.msra.mxu1 %v381_v50 }
 0x110   :  { %874 = vmatprep.subr.mxu1 %v1088_v0 }
 0x111   :  { %875 = vmatpush3.msra.mxu1 %v380_v51 }
 0x112   :  { %876 = vmatprep.subr.mxu1 %v1088_v0 }
 0x113   :  { %877 = vmatpush3.msra.mxu1 %v379_v52 }
 0x114   :  { %878 = vmatprep.subr.mxu1 %v1088_v0 }
 0x115   :  { %879 = vmatpush3.msra.mxu1 %v378_v53 }
 0x116   :  { %880 = vmatprep.subr.mxu1 %v1088_v0 }
 0x117   :  { %881 = vmatpush3.msra.mxu1 %v377_v54 }
 0x118   :  { %882 = vmatprep.subr.mxu1 %v1088_v0 }
 0x119   :  { %883 = vmatpush3.msra.mxu1 %v376_v60 }
 0x11a   :  { %884 = vmatprep.subr.mxu1 %v1088_v0 }
 0x11b   :  { %885 = vmatpush3.msra.mxu1 %v375_v61 }
 0x11c   :  { %886 = vmatprep.subr.mxu1 %v1088_v0 }
 0x11d   :  { %887 = vmatpush3.msra.mxu1 %v374_v62 }
 0x11e   :  { %926 = vmatprep.subr.mxu1 %v1088_v0 }
 0x1be   :  { %v275_v56 = vpop.f32.mrf.mxu1 }
 0x1bf   :  { %v276_v57 = vadd.f32 %v682_v55, %v275_v56 }
 0x1c0   :  { %v820_v58 = vpop.f32.mrf.mxu1 }
 0x1c1   :  { %v279_v59 = vmax.f32 %v276_v57, 0.0 }
 0x1c3   :  { %854 = vmatmul.mubr.f32.vlgmr.msra.gmra.mxu0 %v279_v59 }
 0x1c4   :  { %923 = vmatprep.mubr.msk.f32.mxu0 %vm1089_vm0, %v1088_v0  ;;  %892 = vmatpush3.msra.mxu0 %v483_v63 }
 0x1c5   :  { %893 = vmatprep.subr.mxu0 %v1088_v0 }
 0x1c6   :  { %894 = vmatpush3.msra.mxu0 %v482_v1 }
 0x1c7   :  { %895 = vmatprep.subr.mxu0 %v1088_v0 }
 0x1c8   :  { %896 = vmatpush3.msra.mxu0 %v481_v2 }
 0x1c9   :  { %897 = vmatprep.subr.mxu0 %v1088_v0 }
 0x1ca   :  { %898 = vmatpush3.msra.mxu0 %v480_v3 }
 0x1cb   :  { %899 = vmatprep.subr.mxu0 %v1088_v0 }
 0x1cc   :  { %900 = vmatpush3.msra.mxu0 %v479_v4 }
 0x1cd   :  { %901 = vmatprep.subr.mxu0 %v1088_v0 }
 0x1ce   :  { %902 = vmatpush3.msra.mxu0 %v478_v5 }
 0x1cf   :  { %903 = vmatprep.subr.mxu0 %v1088_v0 }
 0x1d0   :  { %904 = vmatpush3.msra.mxu0 %v477_v6 }
 0x1d1   :  { %905 = vmatprep.subr.mxu0 %v1088_v0 }
 0x1d2   :  { %906 = vmatpush3.msra.mxu0 %v476_v7 }
 0x1d3   :  { %907 = vmatprep.subr.mxu0 %v1088_v0 }
 0x1d4   :  { %908 = vmatpush3.msra.mxu0 %v475_v8 }
 0x1d5   :  { %909 = vmatprep.subr.mxu0 %v1088_v0 }
 0x1d6   :  { %910 = vmatpush3.msra.mxu0 %v474_v9 }
 0x1d7   :  { %911 = vmatprep.subr.mxu0 %v1088_v0 }
 0x1d8   :  { %912 = vmatpush3.msra.mxu0 %v473_v10 }
 0x1d9   :  { %913 = vmatprep.subr.mxu0 %v1088_v0 }
 0x1da   :  { %914 = vmatpush3.msra.mxu0 %v472_v11 }
 0x1db   :  { %915 = vmatprep.subr.mxu0 %v1088_v0 }
 0x1dc   :  { %916 = vmatpush3.msra.mxu0 %v471_v12 }
 0x1dd   :  { %917 = vmatprep.subr.mxu0 %v1088_v0 }
 0x1de   :  { %918 = vmatpush3.msra.mxu0 %v470_v18 }
 0x1df   :  { %919 = vmatprep.subr.mxu0 %v1088_v0 }
 0x1e0   :  { %920 = vmatpush3.msra.mxu0 %v469_v19 }
 0x1e1   :  { %921 = vmatprep.subr.mxu0 %v1088_v0 }
 0x1e2   :  { %922 = vmatpush3.msra.mxu0 %v468_v20 }
 0x283   :  { %v369_v14 = vpop.f32.mrf.mxu0 }
 0x284   :  { %v370_v15 = vadd.f32 %v683_v13, %v369_v14 }
 0x285   :  { %v855_v16 = vpop.f32.mrf.mxu0 }
 0x286   :  { %v373_v17 = vmax.f32 %v370_v15, 0.0 }
 0x288   :  { %889 = vmatmul.mubr.f32.vlgmr.msra.gmra.mxu1 %v373_v17 }
 0x289   :  { %958 = vmatprep.mubr.msk.f32.mxu1 %vm1089_vm0, %v1088_v0  ;;  %927 = vmatpush3.msra.mxu1 %v577_v21 }
 0x28a   :  { %928 = vmatprep.subr.mxu1 %v1088_v0 }
 0x28b   :  { %929 = vmatpush3.msra.mxu1 %v576_v22 }
 0x28c   :  { %930 = vmatprep.subr.mxu1 %v1088_v0 }
 0x28d   :  { %931 = vmatpush3.msra.mxu1 %v575_v23 }
 0x28e   :  { %932 = vmatprep.subr.mxu1 %v1088_v0 }
 0x28f   :  { %933 = vmatpush3.msra.mxu1 %v574_v24 }
 0x290   :  { %934 = vmatprep.subr.mxu1 %v1088_v0 }
 0x291   :  { %935 = vmatpush3.msra.mxu1 %v573_v25 }
 0x292   :  { %936 = vmatprep.subr.mxu1 %v1088_v0 }
 0x293   :  { %937 = vmatpush3.msra.mxu1 %v572_v26 }
 0x294   :  { %938 = vmatprep.subr.mxu1 %v1088_v0 }
 0x295   :  { %939 = vmatpush3.msra.mxu1 %v571_v27 }
 0x296   :  { %940 = vmatprep.subr.mxu1 %v1088_v0 }
 0x297   :  { %941 = vmatpush3.msra.mxu1 %v570_v28 }
 0x298   :  { %942 = vmatprep.subr.mxu1 %v1088_v0 }
 0x299   :  { %943 = vmatpush3.msra.mxu1 %v569_v29 }
 0x29a   :  { %944 = vmatprep.subr.mxu1 %v1088_v0 }
 0x29b   :  { %945 = vmatpush3.msra.mxu1 %v568_v30 }
 0x29c   :  { %946 = vmatprep.subr.mxu1 %v1088_v0 }
 0x29d   :  { %947 = vmatpush3.msra.mxu1 %v567_v31 }
 0x29e   :  { %948 = vmatprep.subr.mxu1 %v1088_v0 }
 0x29f   :  { %949 = vmatpush3.msra.mxu1 %v566_v32 }
 0x2a0   :  { %950 = vmatprep.subr.mxu1 %v1088_v0 }
 0x2a1   :  { %951 = vmatpush3.msra.mxu1 %v565_v33 }
 0x2a2   :  { %952 = vmatprep.subr.mxu1 %v1088_v0 }
 0x2a3   :  { %953 = vmatpush3.msra.mxu1 %v564_v39 }
 0x2a4   :  { %954 = vmatprep.subr.mxu1 %v1088_v0 }
 0x2a5   :  { %955 = vmatpush3.msra.mxu1 %v563_v40 }
 0x2a6   :  { %956 = vmatprep.subr.mxu1 %v1088_v0 }
 0x2a7   :  { %957 = vmatpush3.msra.mxu1 %v562_v41 }
 0x348   :  { %v463_v35 = vpop.f32.mrf.mxu1 }
 0x349   :  { %v464_v36 = vadd.f32 %v684_v34, %v463_v35 }
 0x34a   :  { %v890_v37 = vpop.f32.mrf.mxu1 }
 0x34b   :  { %v467_v38 = vmax.f32 %v464_v36, 0.0 }
 0x34d   :  { %924 = vmatmul.mubr.f32.vlgmr.msra.gmra.mxu0 %v467_v38 }
 0x40d   :  { %v557_v43 = vpop.f32.mrf.mxu0 }
 0x40e   :  { %v558_v44 = vadd.f32 %v685_v42, %v557_v43 }
 0x40f   :  { %v925_v45 = vpop.f32.mrf.mxu0 }
 0x410   :  { %v561_v46 = vmax.f32 %v558_v44, 0.0 }
 0x412   :  { %959 = vmatmul.mubr.f32.vlgmr.msra.gmra.mxu1 %v561_v46 }
 0x4d2   :  { %v651_v48 = vpop.f32.mrf.mxu1 }
 0x4d3   :  { %v652_v0 = vadd.f32 %v686_v47, %v651_v48 }
 0x4d4   :  { %v960_v49 = vpop.f32.mrf.mxu1 }
 0x4d5   :  { %v687_v50 = vmul.f32 -1.442695, %v652_v0 }
 0x4d7   :  { %970 = vpow2.f32 %v687_v50 }
 0x4e4   :  { %v971_v51 = vpop.eup %970 }
 0x4e5   :  { %v658_v52 = vadd.f32 1.0, %v971_v51 }
 0x4e7   :  { %972 = vrcp.f32 %v658_v52 }
 0x4f4   :  { %v973_v53 = vpop.eup %972 }
 0x4f5   :  { %662 = vst.msk [vmem:[#allocation10] sm:$0xff] %vm661_vm2, %v973_v53 }
 0x4f6   :  { %1065 = shalt.err (!%p1062_p10)
}
 0x4f7   :  { %672 = dma.vmem_to_hbm [thread:$0]  %s670_s29, 128, %s1413_s13, [#allocation4]  }
 0x4f8   :  { %1080 = dma.done.wait [#allocation4], 128  }
 0x4f9   :  { %1081 = vsyncadd [#allocation4], 4294967168 }
 0x4fa   :  { %676 = vsyncpa [#allocation3], 1 }
 0x4fb   :  { %677 = vsyncpa [#allocation6], 1 }
 0x4fc   :  { %678 = vsyncpa [#allocation9], 1 }
 0x4fd   :  { %679 = vsyncpa [#allocation4], 1 }

</bundles_post_ra>
